<compile_context>
chip_gen: v6e
topology: v6e:2x2x1
jax: 0.10.0
libtpu: 0.0.40
codegen_flags: <defaults>
</compile_context>

<pallas_src>
import functools

import jax
import jax.numpy as jnp
from jax.experimental import pallas as pl
from jax.experimental.pallas import tpu as pltpu


# --------------------------------------------------------------------------- #
# Kernel
# --------------------------------------------------------------------------- #
def _gnn_scorer_kernel(x_ref, adj_ref, w_ref, b_ref, out_ref, *,
                       relu_flags, compute_dtype):
    """Fused forward over all SAGE layers.

    x_ref   : [N, C_PAD]       f32  node features, zero-padded to C_PAD lanes
    adj_ref : [N, N]           f32  row-normalized adjacency (mean aggregation)
    w_ref   : [L, 2*C_PAD, C_PAD] compute_dtype  BN-folded [W_l; W_r] per layer
    b_ref   : [L_pad, C_PAD]   f32  BN-folded biases, one row per layer
    out_ref : [N, C_PAD]       f32  lane-dense output (scores in column 0)
    """
    adj = adj_ref[...]          # fp32 aggregation: removes the dominant bf16
    h = x_ref[...]              # rounding term; free at this latency-bound size
    b_all = b_ref[...]

    for li, apply_relu in enumerate(relu_flags):
        # mean aggregation over neighbors (rows of adj are row-normalized)
        agg = jnp.dot(adj, h, preferred_element_type=jnp.float32)      # [N, C_PAD]
        # fused aggregate-path + self-path matmul: [agg | x] @ [W_l ; W_r]
        cat = jnp.concatenate([agg, h], axis=-1)                       # [N, 2*C_PAD]
        w = w_ref[li]                                                  # [2*C_PAD, C_PAD]
        h = jnp.dot(cat.astype(compute_dtype), w,
                    preferred_element_type=jnp.float32)                # [N, C_PAD] f32
        h = h + b_all[li:li + 1, :]                                    # bias carries BN shift
        if apply_relu:
            h = jnp.maximum(h, 0.0)
        # TODO(synk): F.dropout in training mode (RNG mask + rescale) not
        # emitted; eval-mode dropout is the identity.

    out_ref[...] = h


# --------------------------------------------------------------------------- #
# One-time host-side parameter preparation (hoisted out of the call path)
# --------------------------------------------------------------------------- #
def prepare_gnn_scorer_params(params, c_pad=128, compute_dtype=jnp.bfloat16):
    """Fold BatchNorm (fp32), fuse W_l/W_r, and pack/pad everything into
    two slabs. Call ONCE per parameter set; result is reused by every forward.
    """
    num_layers = len(params)
    l_pad = max(8, ((num_layers + 7) // 8) * 8)          # sublane-pad bias rows

    w_slab = jnp.zeros((num_layers, 2 * c_pad, c_pad), jnp.float32)
    b_slab = jnp.zeros((l_pad, c_pad), jnp.float32)
    relu_flags = []

    for li, p in enumerate(params):
        # Exact BN fold in fp32 BEFORE any low-precision cast.
        scale = p["bn_scale"].astype(jnp.float32)        # [1, c_out]
        shift = p["bn_shift"].astype(jnp.float32)
        w_l = p["w_l"].astype(jnp.float32) * scale       # [c_in, c_out]
        w_r = p["w_r"].astype(jnp.float32) * scale
        b = p["b"].astype(jnp.float32) * scale + shift   # [1, c_out]
        c_in, c_out = w_l.shape

        # Layout: rows [0:c_in] multiply the aggregated features (adj @ x),
        #         rows [c_pad:c_pad+c_in] multiply the self features (x).
        w_slab = w_slab.at[li, :c_in, :c_out].set(w_l)
        w_slab = w_slab.at[li, c_pad:c_pad + c_in, :c_out].set(w_r)
        b_slab = b_slab.at[li, :c_out].set(b[0])
        relu_flags.append(bool(p["relu"]))

    return dict(
        w=w_slab.astype(compute_dtype),   # bf16 (MXU-native) by default
        b=b_slab,                         # biases stay fp32
        relu_flags=tuple(relu_flags),
        c_pad=c_pad,
        out_channels=params[-1]["w_l"].shape[1],
        compute_dtype=compute_dtype,
    )


# --------------------------------------------------------------------------- #
# Forward wrapper
# --------------------------------------------------------------------------- #
def gnn_scorer_forward(x, adj_norm, packed):
    """Fused gnnScorer forward using pre-packed parameters.

    x        : [N, C_in]  node features
    adj_norm : [N, N]     dense row-normalized adjacency (mean aggregation)
    packed   : output of prepare_gnn_scorer_params
    returns  : [N, out_channels] scores (f32)
    """
    n, c_in = x.shape
    c_pad = packed["c_pad"]

    # Only per-call prep: zero-pad features to the packed lane width + cast.
    x_p = jnp.pad(x.astype(jnp.float32), ((0, 0), (0, c_pad - c_in)))
    adj_f32 = adj_norm.astype(jnp.float32)

    kernel = functools.partial(
        _gnn_scorer_kernel,
        relu_flags=packed["relu_flags"],
        compute_dtype=packed["compute_dtype"],
    )
    vmem_spec = pl.BlockSpec(memory_space=pltpu.MemorySpace.VMEM)

    out = pl.pallas_call(
        kernel,
        out_shape=jax.ShapeDtypeStruct((n, c_pad), jnp.float32),
        in_specs=[vmem_spec, vmem_spec, vmem_spec, vmem_spec],
        out_specs=vmem_spec,
    )(x_p, adj_f32, packed["w"], packed["b"])

    # Lane-dense [N, 128] block in the kernel; slice the real scores on host.
    return out[:, :packed["out_channels"]]


# --------------------------------------------------------------------------- #
# Pure-JAX fp32 reference (original, unfolded / unfused math)
# --------------------------------------------------------------------------- #
def gnn_scorer_reference(x, adj_norm, params):
    x = x.astype(jnp.float32)
    for p in params:
        agg = adj_norm @ x
        h = agg @ p["w_l"] + x @ p["w_r"] + p["b"]
        h = h * p["bn_scale"] + p["bn_shift"]
        if p["relu"]:
            h = jnp.maximum(h, 0.0)
        x = h
    return x


def make_params(key, in_channels, hidden_channels, num_layers):
    """Deterministic synthetic initialization matching gnnScorer.__init__ shapes."""
    dims = [in_channels] + [hidden_channels] * (num_layers - 1) + [1]
    eps = 1e-5
    params = []
    for li in range(num_layers):
        c_in, c_out = dims[li], dims[li + 1]
        key, k1, k2, k3, k4, k5 = jax.random.split(key, 6)
        w_l = jax.random.normal(k1, (c_in, c_out), jnp.float32) / jnp.sqrt(c_in)
        w_r = jax.random.normal(k2, (c_in, c_out), jnp.float32) / jnp.sqrt(c_in)
        b = 0.01 * jax.random.normal(k3, (1, c_out), jnp.float32)
        is_hidden = li < num_layers - 1
        if is_hidden:
            gamma = 1.0 + 0.1 * jax.random.normal(k4, (1, c_out), jnp.float32)
            beta = 0.1 * jax.random.normal(k5, (1, c_out), jnp.float32)
            run_mean = jnp.zeros((1, c_out), jnp.float32)
            run_var = jnp.ones((1, c_out), jnp.float32)
            scale = gamma / jnp.sqrt(run_var + eps)
            shift = beta - run_mean * scale
        else:
            # last SAGEConv has no BN / ReLU
            scale = jnp.ones((1, c_out), jnp.float32)
            shift = jnp.zeros((1, c_out), jnp.float32)
        params.append(dict(w_l=w_l, w_r=w_r, b=b,
                           bn_scale=scale, bn_shift=shift, relu=is_hidden))
    return params


if __name__ == "__main__":
    # Config consistent with the module: in_channels=4, embedding_dim=32,
    # num_gnn_layers=3 (convs: 4->32, 32->32, 32->1), N=16 graph nodes.
    N, IN_CH, HIDDEN, NUM_LAYERS = 16, 4, 32, 3

    key = jax.random.PRNGKey(0)
    k_x, k_adj, k_p = jax.random.split(key, 3)

    x = jax.random.normal(k_x, (N, IN_CH), jnp.float32)

    # adj_norm plays the role of the dense, row-normalized adj_t:
    # rows index destination nodes, so row i is the mean over i's in-neighbors
    # (matches PyG SAGEConv(x, adj_t) with aggr='mean').
    adj = (jax.random.uniform(k_adj, (N, N)) < 0.3).astype(jnp.float32)
    adj = adj * (1.0 - jnp.eye(N, dtype=jnp.float32))         # no self-loops
    deg = jnp.sum(adj, axis=1, keepdims=True)
    adj_norm = adj / jnp.maximum(deg, 1.0)                    # mean aggregation

    params = make_params(k_p, IN_CH, HIDDEN, NUM_LAYERS)

    # One-time parameter prep (BN fold + W_l/W_r fusion + slab packing).
    packed = prepare_gnn_scorer_params(params)

    out = gnn_scorer_forward(x, adj_norm, packed)
    out = jax.block_until_ready(out)

    ref = gnn_scorer_reference(x, adj_norm, params)
    assert out.shape == (N, 1), out.shape
    assert jnp.all(jnp.isfinite(out))
    # Only weights / MXU LHS are bf16 (adj + activations stay fp32) -> well
    # within this tolerance vs. the fp32 reference.
    assert jnp.allclose(out, ref, rtol=1e-1, atol=1e-1), float(
        jnp.max(jnp.abs(out - ref)))
    print("KERNEL_OK")
</pallas_src>

<mosaic_0001>
module attributes {stable_mosaic.version = 11 : i64} {
  func.func @_gnn_scorer_kernel(%arg0: memref<16x128xf32, #tpu.memory_space<vmem>>, %arg1: memref<16x16xf32, #tpu.memory_space<vmem>>, %arg2: memref<3x256x128xbf16, #tpu.memory_space<vmem>>, %arg3: memref<8x128xf32, #tpu.memory_space<vmem>>, %arg4: memref<16x128xf32, #tpu.memory_space<vmem>>) attributes {dimension_semantics = [], scalar_prefetch = 0 : i64, scratch_operands = 0 : i64, tpu.core_type = #tpu.core_type<tc>} {
    %c0 = arith.constant 0 : index
    %c0_0 = arith.constant 0 : index
    %0 = vector.load %arg1[%c0, %c0_0] : memref<16x16xf32, #tpu.memory_space<vmem>>, vector<16x16xf32>
    %c0_1 = arith.constant 0 : index
    %c0_2 = arith.constant 0 : index
    %1 = vector.load %arg0[%c0_1, %c0_2] : memref<16x128xf32, #tpu.memory_space<vmem>>, vector<16x128xf32>
    %c0_3 = arith.constant 0 : index
    %c0_4 = arith.constant 0 : index
    %2 = vector.load %arg3[%c0_3, %c0_4] : memref<8x128xf32, #tpu.memory_space<vmem>>, vector<8x128xf32>
    %cst = arith.constant dense<0.000000e+00> : vector<16x128xf32>
    %3 = tpu.matmul %0, %1, %cst {dimension_numbers = #tpu.dot_dimension_numbers<[1], [0], [0], [1], [0, 0, 1, 1], [], []>} : vector<16x16xf32>, vector<16x128xf32>, vector<16x128xf32> -> vector<16x128xf32>
    %4 = tpu.concatenate %3, %1 in 1 : vector<16x128xf32>, vector<16x128xf32> -> vector<16x256xf32>
    %c0_5 = arith.constant 0 : index
    %c0_6 = arith.constant 0 : index
    %c0_7 = arith.constant 0 : index
    %5 = vector.load %arg2[%c0_5, %c0_6, %c0_7] : memref<3x256x128xbf16, #tpu.memory_space<vmem>>, vector<1x256x128xbf16>
    %6 = vector.shape_cast %5 : vector<1x256x128xbf16> to vector<256x128xbf16>
    %7 = arith.truncf %4 : vector<16x256xf32> to vector<16x256xbf16>
    %cst_8 = arith.constant dense<0.000000e+00> : vector<16x128xf32>
    %8 = tpu.matmul %7, %6, %cst_8 {dimension_numbers = #tpu.dot_dimension_numbers<[1], [0], [0], [1], [0, 0, 1, 1], [], []>} : vector<16x256xbf16>, vector<256x128xbf16>, vector<16x128xf32> -> vector<16x128xf32>
    %9 = vector.extract_strided_slice %2 {offsets = [0, 0], sizes = [1, 128], strides = [1, 1]} : vector<8x128xf32> to vector<1x128xf32>
    %10 = vector.broadcast %9 : vector<1x128xf32> to vector<16x128xf32>
    %11 = arith.addf %8, %10 : vector<16x128xf32>
    %cst_9 = arith.constant 0.000000e+00 : f32
    %12 = vector.broadcast %cst_9 : f32 to vector<16x128xf32>
    %13 = arith.maximumf %11, %12 : vector<16x128xf32>
    %cst_10 = arith.constant dense<0.000000e+00> : vector<16x128xf32>
    %14 = tpu.matmul %0, %13, %cst_10 {dimension_numbers = #tpu.dot_dimension_numbers<[1], [0], [0], [1], [0, 0, 1, 1], [], []>} : vector<16x16xf32>, vector<16x128xf32>, vector<16x128xf32> -> vector<16x128xf32>
    %15 = tpu.concatenate %14, %13 in 1 : vector<16x128xf32>, vector<16x128xf32> -> vector<16x256xf32>
    %c1 = arith.constant 1 : index
    %c0_11 = arith.constant 0 : index
    %c0_12 = arith.constant 0 : index
    %16 = vector.load %arg2[%c1, %c0_11, %c0_12] : memref<3x256x128xbf16, #tpu.memory_space<vmem>>, vector<1x256x128xbf16>
    %17 = vector.shape_cast %16 : vector<1x256x128xbf16> to vector<256x128xbf16>
    %18 = arith.truncf %15 : vector<16x256xf32> to vector<16x256xbf16>
    %cst_13 = arith.constant dense<0.000000e+00> : vector<16x128xf32>
    %19 = tpu.matmul %18, %17, %cst_13 {dimension_numbers = #tpu.dot_dimension_numbers<[1], [0], [0], [1], [0, 0, 1, 1], [], []>} : vector<16x256xbf16>, vector<256x128xbf16>, vector<16x128xf32> -> vector<16x128xf32>
    %20 = vector.extract_strided_slice %2 {offsets = [1, 0], sizes = [1, 128], strides = [1, 1]} : vector<8x128xf32> to vector<1x128xf32>
    %21 = vector.broadcast %20 : vector<1x128xf32> to vector<16x128xf32>
    %22 = arith.addf %19, %21 : vector<16x128xf32>
    %cst_14 = arith.constant 0.000000e+00 : f32
    %23 = vector.broadcast %cst_14 : f32 to vector<16x128xf32>
    %24 = arith.maximumf %22, %23 : vector<16x128xf32>
    %cst_15 = arith.constant dense<0.000000e+00> : vector<16x128xf32>
    %25 = tpu.matmul %0, %24, %cst_15 {dimension_numbers = #tpu.dot_dimension_numbers<[1], [0], [0], [1], [0, 0, 1, 1], [], []>} : vector<16x16xf32>, vector<16x128xf32>, vector<16x128xf32> -> vector<16x128xf32>
    %26 = tpu.concatenate %25, %24 in 1 : vector<16x128xf32>, vector<16x128xf32> -> vector<16x256xf32>
    %c2 = arith.constant 2 : index
    %c0_16 = arith.constant 0 : index
    %c0_17 = arith.constant 0 : index
    %27 = vector.load %arg2[%c2, %c0_16, %c0_17] : memref<3x256x128xbf16, #tpu.memory_space<vmem>>, vector<1x256x128xbf16>
    %28 = vector.shape_cast %27 : vector<1x256x128xbf16> to vector<256x128xbf16>
    %29 = arith.truncf %26 : vector<16x256xf32> to vector<16x256xbf16>
    %cst_18 = arith.constant dense<0.000000e+00> : vector<16x128xf32>
    %30 = tpu.matmul %29, %28, %cst_18 {dimension_numbers = #tpu.dot_dimension_numbers<[1], [0], [0], [1], [0, 0, 1, 1], [], []>} : vector<16x256xbf16>, vector<256x128xbf16>, vector<16x128xf32> -> vector<16x128xf32>
    %31 = vector.extract_strided_slice %2 {offsets = [2, 0], sizes = [1, 128], strides = [1, 1]} : vector<8x128xf32> to vector<1x128xf32>
    %32 = vector.broadcast %31 : vector<1x128xf32> to vector<16x128xf32>
    %33 = arith.addf %30, %32 : vector<16x128xf32>
    %c0_19 = arith.constant 0 : index
    %c0_20 = arith.constant 0 : index
    %34 = vector.load %arg4[%c0_19, %c0_20] : memref<16x128xf32, #tpu.memory_space<vmem>>, vector<16x128xf32>
    tpu.vector_store %arg4[%c0_19, %c0_20], %33 {strides = array<i32>} : memref<16x128xf32, #tpu.memory_space<vmem>>, vector<16x128xf32>,
    return
  }
}

</mosaic_0001>

<bundles_post_ra>
// kernel: tpu_custom_call.1
= control target key start
LH: loop header
LB: loop body
LE: loop exit
PB: predicated region body
PF: predicated region fallthrough
CT: control target
= control target key end

     0   :  { %9 = vsyncpa [#allocation3], 0  ;;  %s1263_s0 = inlined_call_operand.hbm [shape: f32[16,128], index: 0, kind: input, shape index: {}]   ;;  %s1264_s1 = inlined_call_operand.hbm [shape: f32[16,16], index: 1, kind: input, shape index: {}]   ;;  %s1265_s2 = inlined_call_operand.hbm [shape: bf16[3,256,128], index: 2, kind: input, shape index: {}]   ;;  %s1266_s3 = inlined_call_operand.hbm [shape: f32[8,128], index: 3, kind: input, shape index: {}]   ;;  %s1267_s4 = inlined_call_operand.hbm [shape: f32[16,128], index: 4, kind: output, shape index: {}]  }
   0x1   :  { %10 = vsyncpa [#allocation6], 0 }
   0x2   :  { %11 = vsyncpa [#allocation9], 0 }
   0x3   :  { %12 = vsyncpa [#allocation4], 0  ;;  %s1179_s15 = smov [#allocation5]   ;;  %s1180_s17 = smov [#allocation2]  }
   0x4   :  { %s30_s16 = sshll.u32 %s1179_s15, 4  ;;  %s18_s18 = sshll.u32 %s1180_s17, 4  ;;  %s31_s16 = int_to_ptr.vmem [resolvable:$true] %s30_s16  ;;  %s19_s18 = int_to_ptr.vmem [resolvable:$true] %s18_s18 }
   0x5   :  { %s1079_s19 = scalar_lea.vmem %s31_s16, 256  ;;  %p1084_p1 = scmp.lt.s32.totalorder %s31_s16, %s31_s16 }
   0x6   :  { %p1080_p0 = scmp.ne.s32.totalorder %s31_s16, %s1079_s19  ;;  %p1085_p2 = scmp.lt.s32.totalorder %s1079_s19, %s1079_s19 }
   0x8   :  { %p1086_p3 = por %p1085_p2, %p1084_p1 }
   0xa   :  { %p1087_p4 = pnand %p1086_p3, %p1080_p0 }
   0xc   :  { %1090 = shalt.err (!%p1087_p4)
}
   0xd   :  { %s1181_s20 = smov 128   ;;  %s1182_s21 = smov 8  }
   0xe   :  { %36 = dma.hbm_to_vmem [thread:$0]  %s1264_s1, 256, %s31_s16, [#allocation6], %s1181_s20, %s1181_s20, %s1182_s21  }
   0xf   :  { %s1099_s24 = scalar_lea.vmem %s19_s18, 256  ;;  %p1104_p6 = scmp.lt.s32.totalorder %s19_s18, %s19_s18 }
  0x10   :  { %p1100_p5 = scmp.ne.s32.totalorder %s19_s18, %s1099_s24  ;;  %p1105_p7 = scmp.lt.s32.totalorder %s1099_s24, %s1099_s24 }
  0x12   :  { %p1106_p8 = por %p1105_p7, %p1104_p6 }
  0x14   :  { %p1107_p9 = pnand %p1106_p8, %p1100_p5 }
  0x16   :  { %1110 = shalt.err (!%p1107_p9)
}
  0x17   :  { %24 = dma.hbm_to_vmem [thread:$0]  %s1263_s0, 256, %s19_s18, [#allocation3], %s1181_s20, %s1181_s20, %s1182_s21  }
  0x18   :  { %s1183_s27 = smov [#allocation7]  }
  0x19   :  { %s42_s28 = sshll.u32 %s1183_s27, 4  ;;  %s43_s28 = int_to_ptr.vmem [resolvable:$true] %s42_s28 }
  0x1a   :  { %s1119_s29 = scalar_lea.vmem %s43_s28, 6144  ;;  %p1124_p11 = scmp.lt.s32.totalorder %s43_s28, %s43_s28 }
  0x1b   :  { %p1120_p10 = scmp.ne.s32.totalorder %s43_s28, %s1119_s29  ;;  %p1125_p12 = scmp.lt.s32.totalorder %s1119_s29, %s1119_s29 }
  0x1d   :  { %p1126_p13 = por %p1125_p12, %p1124_p11 }
  0x1f   :  { %p1127_p0 = pnand %p1126_p13, %p1120_p10 }
  0x21   :  { %1130 = shalt.err (!%p1127_p0)
}
  0x22   :  { %s1184_s1 = smov 64   ;;  %s1185_s30 = smov 4  }
  0x23   :  { %48 = dma.hbm_to_vmem [thread:$0]  %s1265_s2, 6144, %s43_s28, [#allocation6], %s1184_s1, %s1184_s1, %s1185_s30  }
  0x24   :  { %s1186_s7 = smov [#allocation8]  }
  0x25   :  { %s55_s8 = sshll.u32 %s1186_s7, 4  ;;  %s56_s8 = int_to_ptr.vmem [resolvable:$true] %s55_s8 }
  0x26   :  { %s1139_s0 = scalar_lea.vmem %s56_s8, 128  ;;  %p1144_p2 = scmp.lt.s32.totalorder %s56_s8, %s56_s8 }
  0x27   :  { %p1140_p1 = scmp.ne.s32.totalorder %s56_s8, %s1139_s0  ;;  %p1145_p3 = scmp.lt.s32.totalorder %s1139_s0, %s1139_s0 }
  0x29   :  { %p1146_p4 = por %p1145_p3, %p1144_p2 }
  0x2b   :  { %p1147_p5 = pnand %p1146_p4, %p1140_p1 }
  0x2d   :  { %1150 = shalt.err (!%p1147_p5)
}
  0x2e   :  { %58 = dma.hbm_to_vmem [thread:$0]  %s1266_s3, 128, %s56_s8, [#allocation9]  }
  0x2f   :  { %1171 = dma.done.wait [#allocation3], 256  }
  0x30   :  { %1172 = vsyncadd [#allocation3], 4294967040 }
  0x31   :  { %1173 = dma.done.wait [#allocation6], 6400  }
  0x32   :  { %1174 = vsyncadd [#allocation6], 4294960896 }
  0x33   :  { %1175 = dma.done.wait [#allocation9], 128  }
  0x34   :  { %1176 = vsyncadd [#allocation9], 4294967168  ;;  %vm77_vm0 = vcmask 130048   ;;  %v75_v0 = vld [vmem:[#allocation2 + $0x8] sm:$0xff]  ;;  %v74_v1 = vld [vmem:[#allocation2] sm:$0xff]  ;;  %v193_v38 = vlaneseq  ;;  %s1187_s2 = smov [#allocation10]  }
  0x35   :  { %v1231_v2 = vld [vmem:[#allocation5] sm:$0xff]  ;;  %993 = vmatprep.subr.mxu1 %v75_v0  ;;  %v1235_v3 = vld [vmem:[#allocation5 + $0x8] sm:$0xff]  ;;  %v1027_v8 = vld [vmem:[#allocation7 + $0x68] sm:$0xff]   ;;  %v192_v20 = vpack.c.bf16 %v75_v0, %v74_v1  ;;  %s847_s3 = sshll.u32 %s1187_s2, 4  ;;  %s848_s3 = int_to_ptr.vmem [resolvable:$true] %s847_s3 }
  0x36   :  { %997 = vmatprep.mubr.msk.f32.mxu1 %vm77_vm0, %v1231_v2  ;;  %994 = vmatpush3.msra.mxu1 %v75_v0  ;;  %v1023_v4 = vld [vmem:[#allocation7 + $0x78] sm:$0xff]   ;;  %v1025_v6 = vld [vmem:[#allocation7 + $0x70] sm:$0xff]   ;;  %v1028_v9 = vld [vmem:[#allocation7 + $0x28] sm:$0xff]   ;;  %v1241_v39 = vshrl.u32 %v193_v38, 7  ;;  %s1151_s11 = scalar_lea.vmem %s848_s3, 256  ;;  %p1156_p7 = scmp.lt.s32.totalorder %s848_s3, %s848_s3 }
  0x37   :  { %995 = vmatprep.subr.mxu1 %v74_v1  ;;  %v1024_v5 = vld [vmem:[#allocation7 + $0x38] sm:$0xff]   ;;  %v1026_v7 = vld [vmem:[#allocation7 + $0x30] sm:$0xff]   ;;  %v1029_v10 = vld [vmem:[#allocation7 + $0x60] sm:$0xff]   ;;  %p1152_p6 = scmp.ne.s32.totalorder %s848_s3, %s1151_s11  ;;  %p1157_p8 = scmp.lt.s32.totalorder %s1151_s11, %s1151_s11 }
  0x38   :  { %996 = vmatpush3.msra.mxu1 %v74_v1  ;;  %v1030_v11 = vld [vmem:[#allocation7 + $0x20] sm:$0xff]   ;;  %v1031_v12 = vld [vmem:[#allocation7 + $0x58] sm:$0xff]   ;;  %v1033_v14 = vld [vmem:[#allocation7 + $0x50] sm:$0xff]   ;;  %v195_v40 = vsub.s32 0, %v1241_v39 }
  0x39   :  { %998 = vmatmul.mubr.msk.f32.vlgmr.msra.gmra.mxu1 %vm77_vm0, %v1235_v3  ;;  %919 = vmatprep.subr.bf16.mxu1 %v1023_v4  ;;  %v1032_v13 = vld [vmem:[#allocation7 + $0x18] sm:$0xff]   ;;  %v1034_v15 = vld [vmem:[#allocation7 + $0x10] sm:$0xff]   ;;  %v1035_v16 = vld [vmem:[#allocation7 + $0x48] sm:$0xff]   ;;  %p1158_p9 = por %p1157_p8, %p1156_p7 }
  0x3a   :  { %920 = vmatpush3.bf16.msra.mxu1 %v1024_v5  ;;  %v1036_v17 = vld [vmem:[#allocation7 + $0x8] sm:$0xff]   ;;  %v1037_v18 = vld [vmem:[#allocation7 + $0x40] sm:$0xff]   ;;  %325 = vmatprep.mubr.bf16.mxu1 %v192_v20  ;;  %v1039_v24 = vld [vmem:[#allocation7 + $0xf8] sm:$0xff]  }
  0x3b   :  { %921 = vmatprep.subr.bf16.mxu1 %v1025_v6  ;;  %v1038_v19 = vld [vmem:[#allocation7] sm:$0xff]   ;;  %v1040_v25 = vld [vmem:[#allocation7 + $0xb8] sm:$0xff]   ;;  %v1041_v26 = vld [vmem:[#allocation7 + $0xf0] sm:$0xff]   ;;  %945 = vmatprep.subr.bf16.mxu0 %v1039_v24  ;;  %p1159_p10 = pnand %p1158_p9, %p1152_p6 }
  0x3c   :  { %946 = vmatpush3.bf16.msra.mxu0 %v1040_v25  ;;  %v1042_v27 = vld [vmem:[#allocation7 + $0xb0] sm:$0xff]   ;;  %v1043_v28 = vld [vmem:[#allocation7 + $0xe8] sm:$0xff]   ;;  %v1045_v30 = vld [vmem:[#allocation7 + $0xe0] sm:$0xff]  }
  0x3d   :  { %947 = vmatprep.subr.bf16.mxu0 %v1041_v26  ;;  %v1044_v29 = vld [vmem:[#allocation7 + $0xa8] sm:$0xff]   ;;  %v1046_v31 = vld [vmem:[#allocation7 + $0xa0] sm:$0xff]   ;;  %v1047_v32 = vld [vmem:[#allocation7 + $0xd8] sm:$0xff]  }
  0x3e   :  { %922 = vmatpush3.bf16.msra.mxu1 %v1026_v7  ;;  %v1048_v33 = vld [vmem:[#allocation7 + $0x98] sm:$0xff]   ;;  %v1049_v34 = vld [vmem:[#allocation7 + $0xd0] sm:$0xff]   ;;  %v1051_v36 = vld [vmem:[#allocation7 + $0xc8] sm:$0xff]  }
  0x3f   :  { %923 = vmatprep.subr.bf16.mxu1 %v1027_v8  ;;  %v1050_v35 = vld [vmem:[#allocation7 + $0x90] sm:$0xff]   ;;  %v1052_v37 = vld [vmem:[#allocation7 + $0x88] sm:$0xff]   ;;  %v1244_v42 = vld [vmem:[#allocation8] sm:$0xff] }
  0x40   :  { %948 = vmatpush3.bf16.msra.mxu0 %v1042_v27  ;;  %v196_v44 = vrot.slane %v1244_v42, %v195_v40  ;;  %v1053_v54 = vld [vmem:[#allocation7 + $0xc0] sm:$0xff]   ;;  %v1055_v59 = vld [vmem:[#allocation7 + $0x178] sm:$0xff]   ;;  %v1057_v61 = vld [vmem:[#allocation7 + $0x170] sm:$0xff]  }
  0x41   :  { %949 = vmatprep.subr.bf16.mxu0 %v1043_v28  ;;  %v1054_v55 = vld [vmem:[#allocation7 + $0x80] sm:$0xff]   ;;  %v1056_v60 = vld [vmem:[#allocation7 + $0x138] sm:$0xff]   ;;  %v1058_v62 = vld [vmem:[#allocation7 + $0x130] sm:$0xff]   ;;  %v701_v28 = vsub.s32 2, %v1241_v39 }
  0x42   :  { %924 = vmatpush3.bf16.msra.mxu1 %v1028_v9  ;;  %v1059_v63 = vld [vmem:[#allocation7 + $0x168] sm:$0xff]   ;;  %v1061_v1 = vld [vmem:[#allocation7 + $0x160] sm:$0xff]   ;;  %v1063_v4 = vld [vmem:[#allocation7 + $0x158] sm:$0xff]  }
  0x43   :  { %925 = vmatprep.subr.bf16.mxu1 %v1029_v10  ;;  %v1060_v0 = vld [vmem:[#allocation7 + $0x128] sm:$0xff]   ;;  %v1064_v5 = vld [vmem:[#allocation7 + $0x118] sm:$0xff]   ;;  %v1065_v6 = vld [vmem:[#allocation7 + $0x150] sm:$0xff]   ;;  %v448_v10 = vsub.s32 1, %v1241_v39 }
  0x44   :  { %950 = vmatpush3.bf16.msra.mxu0 %v1044_v29  ;;  %v1066_v7 = vld [vmem:[#allocation7 + $0x110] sm:$0xff]   ;;  %v1067_v8 = vld [vmem:[#allocation7 + $0x148] sm:$0xff]   ;;  %v1070_v24 = vld [vmem:[#allocation7 + $0x100] sm:$0xff]  }
  0x45   :  { %951 = vmatprep.subr.bf16.mxu0 %v1045_v30  ;;  %v1068_v9 = vld [vmem:[#allocation7 + $0x108] sm:$0xff]   ;;  %v702_v30 = vrot.slane %v1244_v42, %v701_v28 }
  0x46   :  { %926 = vmatpush3.bf16.msra.mxu1 %v1030_v11 }
  0x47   :  { %927 = vmatprep.subr.bf16.mxu1 %v1031_v12 }
  0x48   :  { %952 = vmatpush3.bf16.msra.mxu0 %v1046_v31 }
  0x49   :  { %953 = vmatprep.subr.bf16.mxu0 %v1047_v32 }
  0x4a   :  { %928 = vmatpush3.bf16.msra.mxu1 %v1032_v13  ;;  %v449_v13 = vrot.slane %v1244_v42, %v448_v10 }
  0x4b   :  { %929 = vmatprep.subr.bf16.mxu1 %v1033_v14 }
  0x4c   :  { %954 = vmatpush3.bf16.msra.mxu0 %v1048_v33 }
  0x4d   :  { %955 = vmatprep.subr.bf16.mxu0 %v1049_v34 }
  0x4e   :  { %930 = vmatpush3.bf16.msra.mxu1 %v1034_v15 }
  0x4f   :  { %931 = vmatprep.subr.bf16.mxu1 %v1035_v16 }
  0x50   :  { %956 = vmatpush3.bf16.msra.mxu0 %v1050_v35 }
  0x51   :  { %957 = vmatprep.subr.bf16.mxu0 %v1051_v36 }
  0x52   :  { %932 = vmatpush3.bf16.msra.mxu1 %v1036_v17 }
  0x53   :  { %933 = vmatprep.subr.bf16.mxu1 %v1037_v18 }
  0x54   :  { %958 = vmatpush3.bf16.msra.mxu0 %v1052_v37 }
  0x55   :  { %959 = vmatprep.subr.bf16.mxu0 %v1053_v54 }
  0x56   :  { %934 = vmatpush3.bf16.msra.mxu1 %v1038_v19 }
  0x58   :  { %960 = vmatpush3.bf16.msra.mxu0 %v1054_v55 }
  0x59   :  { %971 = vmatprep.subr.bf16.mxu0 %v1055_v59 }
  0xf9   :  { %v999_v21 = vpop.f32.mrf.mxu1 }
  0xfb   :  { %v150_v22 = vpop.f32.mrf.mxu1 }
  0xfc   :  { %v191_v23 = vpack.c.bf16 %v999_v21, %v150_v22 }
  0xfe   :  { %326 = vmatmul.mubr.bf16.vlgmr.msra.gmra.mxu1 %v191_v23  ;;  %v1069_v23 = vld [vmem:[#allocation7 + $0x140] sm:$0xff]  }
  0xff   :  { %1004 = vmatprep.mubr.msk.f32.mxu1 %vm77_vm0, %v1231_v2 }
 0x1be   :  { %v935_v41 = vpop.f32.mrf.mxu1 }
 0x1c0   :  { %v936_v43 = vpop.f32.mrf.mxu1 }
 0x1c1   :  { %v937_v45 = vadd.f32 %v936_v43, %v935_v41 }
 0x1c2   :  { %v938_v46 = vpop.f32.mrf.mxu1 }
 0x1c3   :  { %v328_v48 = vadd.f32 %v937_v45, %v196_v44 }
 0x1c4   :  { %v939_v47 = vpop.f32.mrf.mxu1 }
 0x1c5   :  { %v940_v49 = vadd.f32 %v939_v47, %v938_v46  ;;  %v334_v51 = vmax.f32 %v328_v48, 0.0 }
 0x1c7   :  { %v331_v50 = vadd.f32 %v940_v49, %v196_v44 }
 0x1c9   :  { %v335_v52 = vmax.f32 %v331_v50, 0.0 }
 0x1cb   :  { %1000 = vmatprep.subr.mxu1 %v335_v52  ;;  %v445_v53 = vpack.c.bf16 %v335_v52, %v334_v51 }
 0x1cc   :  { %1001 = vmatpush3.msra.mxu1 %v335_v52 }
 0x1cd   :  { %1002 = vmatprep.subr.mxu1 %v334_v51  ;;  %578 = vmatprep.mubr.bf16.mxu0 %v445_v53 }
 0x1ce   :  { %1003 = vmatpush3.msra.mxu1 %v334_v51 }
 0x1cf   :  { %1005 = vmatmul.mubr.msk.f32.vlgmr.msra.gmra.mxu1 %vm77_vm0, %v1235_v3 }
 0x1d0   :  { %1011 = vmatprep.mubr.msk.f32.mxu1 %vm77_vm0, %v1231_v2  ;;  %v1062_v2 = vld [vmem:[#allocation7 + $0x120] sm:$0xff]  }
 0x28f   :  { %v1006_v56 = vpop.f32.mrf.mxu1 }
 0x291   :  { %v402_v57 = vpop.f32.mrf.mxu1 }
 0x292   :  { %v444_v58 = vpack.c.bf16 %v1006_v56, %v402_v57 }
 0x294   :  { %579 = vmatmul.mubr.bf16.vlgmr.msra.gmra.mxu0 %v444_v58 }
 0x295   :  { %972 = vmatpush3.bf16.msra.mxu0 %v1056_v60 }
 0x296   :  { %973 = vmatprep.subr.bf16.mxu0 %v1057_v61 }
 0x299   :  { %974 = vmatpush3.bf16.msra.mxu0 %v1058_v62 }
 0x29a   :  { %975 = vmatprep.subr.bf16.mxu0 %v1059_v63 }
 0x29d   :  { %976 = vmatpush3.bf16.msra.mxu0 %v1060_v0 }
 0x29e   :  { %977 = vmatprep.subr.bf16.mxu0 %v1061_v1 }
 0x2a1   :  { %978 = vmatpush3.bf16.msra.mxu0 %v1062_v2 }
 0x2a2   :  { %979 = vmatprep.subr.bf16.mxu0 %v1063_v4 }
 0x2a5   :  { %980 = vmatpush3.bf16.msra.mxu0 %v1064_v5 }
 0x2a6   :  { %981 = vmatprep.subr.bf16.mxu0 %v1065_v6 }
 0x2a9   :  { %982 = vmatpush3.bf16.msra.mxu0 %v1066_v7 }
 0x2aa   :  { %983 = vmatprep.subr.bf16.mxu0 %v1067_v8 }
 0x2ad   :  { %984 = vmatpush3.bf16.msra.mxu0 %v1068_v9 }
 0x2ae   :  { %985 = vmatprep.subr.bf16.mxu0 %v1069_v23 }
 0x2b1   :  { %986 = vmatpush3.bf16.msra.mxu0 %v1070_v24 }
 0x354   :  { %v961_v11 = vpop.f32.mrf.mxu0 }
 0x356   :  { %v962_v12 = vpop.f32.mrf.mxu0 }
 0x357   :  { %v963_v14 = vadd.f32 %v962_v12, %v961_v11 }
 0x358   :  { %v964_v15 = vpop.f32.mrf.mxu0 }
 0x359   :  { %v581_v17 = vadd.f32 %v963_v14, %v449_v13 }
 0x35a   :  { %v965_v16 = vpop.f32.mrf.mxu0 }
 0x35b   :  { %v966_v18 = vadd.f32 %v965_v16, %v964_v15  ;;  %v587_v20 = vmax.f32 %v581_v17, 0.0 }
 0x35d   :  { %v584_v19 = vadd.f32 %v966_v18, %v449_v13 }
 0x35f   :  { %v588_v21 = vmax.f32 %v584_v19, 0.0 }
 0x361   :  { %1007 = vmatprep.subr.mxu1 %v588_v21  ;;  %v698_v22 = vpack.c.bf16 %v588_v21, %v587_v20 }
 0x362   :  { %1008 = vmatpush3.msra.mxu1 %v588_v21 }
 0x363   :  { %1009 = vmatprep.subr.mxu1 %v587_v20  ;;  %831 = vmatprep.mubr.bf16.mxu0 %v698_v22 }
 0x364   :  { %1010 = vmatpush3.msra.mxu1 %v587_v20 }
 0x365   :  { %1012 = vmatmul.mubr.msk.f32.vlgmr.msra.gmra.mxu1 %vm77_vm0, %v1235_v3 }
 0x425   :  { %v1013_v25 = vpop.f32.mrf.mxu1 }
 0x427   :  { %v655_v26 = vpop.f32.mrf.mxu1 }
 0x428   :  { %v697_v27 = vpack.c.bf16 %v1013_v25, %v655_v26 }
 0x42a   :  { %832 = vmatmul.mubr.bf16.vlgmr.msra.gmra.mxu0 %v697_v27 }
 0x4ea   :  { %v987_v29 = vpop.f32.mrf.mxu0 }
 0x4ec   :  { %v988_v31 = vpop.f32.mrf.mxu0 }
 0x4ed   :  { %v989_v32 = vadd.f32 %v988_v31, %v987_v29 }
 0x4ee   :  { %v990_v33 = vpop.f32.mrf.mxu0 }
 0x4ef   :  { %v834_v34 = vadd.f32 %v989_v32, %v702_v30 }
 0x4f0   :  { %v991_v35 = vpop.f32.mrf.mxu0 }
 0x4f1   :  { %840 = vst [vmem:[#allocation10] sm:$0xff] %v834_v34  ;;  %v992_v3 = vadd.f32 %v991_v35, %v990_v33 }
 0x4f3   :  { %v837_v36 = vadd.f32 %v992_v3, %v702_v30 }
 0x4f5   :  { %841 = vst [vmem:[#allocation10 + $0x8] sm:$0xff] %v837_v36 }
 0x4f6   :  { %1162 = shalt.err (!%p1159_p10)
}
 0x4f7   :  { %853 = dma.vmem_to_hbm [thread:$0]  %s848_s3, 256, %s1267_s4, [#allocation4], %s1181_s20, %s1181_s20, %s1182_s21  }
 0x4f8   :  { %1177 = dma.done.wait [#allocation4], 256  }
 0x4f9   :  { %1178 = vsyncadd [#allocation4], 4294967040 }
 0x4fa   :  { %857 = vsyncpa [#allocation3], 1 }
 0x4fb   :  { %858 = vsyncpa [#allocation6], 1 }
 0x4fc   :  { %859 = vsyncpa [#allocation9], 1 }
 0x4fd   :  { %860 = vsyncpa [#allocation4], 1 }

</bundles_post_ra>
